<compile_context>
chip_gen: v7x
topology: tpu7x:2x2x1
jax: 0.10.0
libtpu: 0.0.40
codegen_flags: <defaults>
</compile_context>

<pallas_src>
import math

import jax
import jax.numpy as jnp
from jax.experimental import pallas as pl
from jax.experimental.pallas import tpu as pltpu


def _round_up(x, m):
    return ((x + m - 1) // m) * m


def _modular_linear_kernel_single(x_ref, w_ref, b_ref, o_ref, acc_ref):
    """One module per grid step (module dim squeezed).

    x_ref: (B, tk), w_ref: (tk, tn), b_ref: (1, tn), o_ref: (B, tn),
    acc_ref: (B, tn) f32 scratch.
    """
    k = pl.program_id(2)

    @pl.when(k == 0)
    def _init():
        acc_ref[...] = jnp.zeros_like(acc_ref)

    acc_ref[...] += jnp.dot(x_ref[...], w_ref[...],
                            preferred_element_type=jnp.float32)

    @pl.when(k == pl.num_programs(2) - 1)
    def _finalize():
        # Bias added exactly once, in f32, in the K-epilogue; single cast at store.
        o_ref[...] = (acc_ref[...] + b_ref[...].astype(jnp.float32)).astype(o_ref.dtype)


def _modular_linear_kernel_batched(x_ref, w_ref, b_ref, o_ref, acc_ref):
    """mblk modules per grid step (amortizes per-step overhead for tiny modules).

    x_ref: (mblk, B, tk), w_ref: (mblk, tk, tn), b_ref: (mblk, 1, tn),
    o_ref: (mblk, B, tn), acc_ref: (mblk, B, tn) f32 scratch.
    """
    k = pl.program_id(2)

    @pl.when(k == 0)
    def _init():
        acc_ref[...] = jnp.zeros_like(acc_ref)

    acc_ref[...] += jnp.einsum('mbi,mio->mbo', x_ref[...], w_ref[...],
                               preferred_element_type=jnp.float32)

    @pl.when(k == pl.num_programs(2) - 1)
    def _finalize():
        o_ref[...] = (acc_ref[...] + b_ref[...].astype(jnp.float32)).astype(o_ref.dtype)


def modular_linear(x, weight, bias, *,
                   max_tn=512, max_tk=512,
                   vmem_budget_bytes=20 * 1024 * 1024):
    """out[m] = x[m] @ weight[m] + bias[m].

    x: (M, B, I), weight: (M, I, O), bias: (M, 1, O) -> (M, B, O).
    """
    M, B, I = x.shape
    Mw, Iw, O = weight.shape
    assert (Mw, Iw) == (M, I) and bias.shape == (M, 1, O)
    out_dtype = x.dtype
    itemsize = jnp.dtype(out_dtype).itemsize

    # --- Tile sizes: lane-dense (128-aligned) N and K tiles, sublane-aligned B.
    Bp = _round_up(B, 8)
    tn = min(_round_up(O, 128), max_tn)
    tk = min(_round_up(I, 128), max_tk)
    Op = _round_up(O, tn)
    Ip = _round_up(I, tk)

    # --- Modules per grid step: amortize per-step overhead when modules are tiny,
    #     while keeping (double-buffered tiles + f32 accumulator) under the VMEM
    #     budget (sized for v7x's smaller VMEM as well).
    per_module_bytes = (2 * (Bp * tk + tk * tn + tn) * itemsize   # inputs, 2-buffered
                        + 2 * Bp * tn * itemsize                  # output, 2-buffered
                        + Bp * tn * 4)                            # f32 accumulator
    mblk = max(1, min(M, vmem_budget_bytes // per_module_bytes))
    if Op // tn == 1:
        # Keep >= 2 independent "parallel" grid units for dual-TensorCore chips.
        mblk = min(mblk, max(1, M // 2))
    while M % mblk:  # avoid padding the module axis
        mblk -= 1

    # --- Zero-pad to tile multiples (zero rows/cols contribute nothing).
    # TODO(synk): also tile the batch axis for very large B instead of holding the
    #             whole (B, tk)/(B, tn) slab per grid step.
    xp = x if (Bp == B and Ip == I) else jnp.pad(x, ((0, 0), (0, Bp - B), (0, Ip - I)))
    wp = weight if (Ip == I and Op == O) else jnp.pad(
        weight, ((0, 0), (0, Ip - I), (0, Op - O)))
    bp = bias if Op == O else jnp.pad(bias, ((0, 0), (0, 0), (0, Op - O)))

    grid = (M // mblk, Op // tn, Ip // tk)

    if mblk == 1:
        kernel = _modular_linear_kernel_single
        # Leading module dim squeezed -> kernel sees plain 2-D (sublane, lane) tiles.
        in_specs = [
            pl.BlockSpec((None, Bp, tk), lambda m, n, k: (m, 0, k)),
            pl.BlockSpec((None, tk, tn), lambda m, n, k: (m, k, n)),
            pl.BlockSpec((None, 1, tn), lambda m, n, k: (m, 0, n)),
        ]
        out_specs = pl.BlockSpec((None, Bp, tn), lambda m, n, k: (m, 0, n))
        acc_shape = (Bp, tn)
    else:
        kernel = _modular_linear_kernel_batched
        in_specs = [
            pl.BlockSpec((mblk, Bp, tk), lambda m, n, k: (m, 0, k)),
            pl.BlockSpec((mblk, tk, tn), lambda m, n, k: (m, k, n)),
            pl.BlockSpec((mblk, 1, tn), lambda m, n, k: (m, 0, n)),
        ]
        out_specs = pl.BlockSpec((mblk, Bp, tn), lambda m, n, k: (m, 0, n))
        acc_shape = (mblk, Bp, tn)

    out_padded = pl.pallas_call(
        kernel,
        out_shape=jax.ShapeDtypeStruct((M, Bp, Op), out_dtype),
        grid_spec=pltpu.PrefetchScalarGridSpec(
            num_scalar_prefetch=0,
            grid=grid,
            in_specs=in_specs,
            out_specs=out_specs,
            scratch_shapes=[pltpu.VMEM(acc_shape, jnp.float32)],
        ),
        compiler_params=pltpu.CompilerParams(
            dimension_semantics=("parallel", "parallel", "arbitrary"),
            vmem_limit_bytes=32 * 1024 * 1024,
        ),
        cost_estimate=pl.CostEstimate(
            flops=2 * M * B * I * O,
            transcendentals=0,
            bytes_accessed=(x.size + weight.size + bias.size + M * B * O) * itemsize,
        ),
    )(xp, wp, bp)

    if Bp != B or Op != O:
        out_padded = out_padded[:, :B, :O]
    return out_padded


def init_params(key, num_modules, in_features, out_features, dtype=jnp.float32):
    """Matches reset_parameters(): U(-1/sqrt(in_features), 1/sqrt(in_features))."""
    std_dev = 1.0 / math.sqrt(in_features)
    kw, kb = jax.random.split(key)
    weight = jax.random.uniform(
        kw, (num_modules, in_features, out_features),
        minval=-std_dev, maxval=std_dev, dtype=dtype)
    bias = jax.random.uniform(
        kb, (num_modules, 1, out_features),
        minval=-std_dev, maxval=std_dev, dtype=dtype)
    return weight, bias


def _check(x, weight, bias, **kwargs):
    out = jax.block_until_ready(modular_linear(x, weight, bias, **kwargs))
    ref = jnp.matmul(x, weight) + bias
    assert out.shape == ref.shape, (out.shape, ref.shape)
    assert jnp.allclose(out, ref, atol=2e-5, rtol=2e-5), float(
        jnp.max(jnp.abs(out - ref)))


if __name__ == "__main__":
    key = jax.random.PRNGKey(0)
    kx, kp, kx2, kp2 = jax.random.split(key, 4)

    # Case 1: spec-sized toy shapes (exercises the module-batched path + O/I padding).
    num_modules, batch, in_features, out_features = 4, 8, 32, 32
    x = jax.random.normal(kx, (num_modules, batch, in_features), dtype=jnp.float32)
    weight, bias = init_params(kp, num_modules, in_features, out_features)
    _check(x, weight, bias)

    # Case 2: ragged shapes (exercises the squeezed single-module path + B/I/O padding).
    num_modules2, batch2, in_features2, out_features2 = 3, 5, 20, 40
    x2 = jax.random.normal(kx2, (num_modules2, batch2, in_features2), dtype=jnp.float32)
    weight2, bias2 = init_params(kp2, num_modules2, in_features2, out_features2)
    _check(x2, weight2, bias2)

    print("KERNEL_OK")
</pallas_src>

<mosaic_0001>
module attributes {stable_mosaic.version = 11 : i64} {
  func.func @_modular_linear_kernel_batched(%arg0: i32, %arg1: i32, %arg2: i32, %arg3: memref<2x8x128xf32, #tpu.memory_space<vmem>>, %arg4: memref<2x128x128xf32, #tpu.memory_space<vmem>>, %arg5: memref<2x1x128xf32, #tpu.memory_space<vmem>>, %arg6: memref<2x8x128xf32, #tpu.memory_space<vmem>>, %arg7: memref<2x8x128xf32, #tpu.memory_space<vmem>>) attributes {dimension_semantics = [#tpu.dimension_semantics<parallel>, #tpu.dimension_semantics<parallel>, #tpu.dimension_semantics<arbitrary>], iteration_bounds = array<i64: 2, 1, 1>, scalar_prefetch = 0 : i64, scratch_operands = 1 : i64, tpu.core_type = #tpu.core_type<tc>, window_params = [{transform_indices = @transform_0, window_bounds = array<i64: 2, 8, 128>}, {transform_indices = @transform_1, window_bounds = array<i64: 2, 128, 128>}, {transform_indices = @transform_2, window_bounds = array<i64: 2, 1, 128>}, {transform_indices = @transform_3, window_bounds = array<i64: 2, 8, 128>}]} {
    %c0_i32 = arith.constant 0 : i32
    %0 = arith.cmpi eq, %arg2, %c0_i32 : i32
    %1 = arith.extui %0 : i1 to i32
    %c0_i32_0 = arith.constant 0 : i32
    %2 = arith.cmpi ne, %1, %c0_i32_0 : i32
    scf.if %2 {
      %cst_14 = arith.constant 0.000000e+00 : f32
      %12 = vector.broadcast %cst_14 : f32 to vector<2x8x128xf32>
      %c0_15 = arith.constant 0 : index
      %c0_16 = arith.constant 0 : index
      %c0_17 = arith.constant 0 : index
      %13 = vector.load %arg7[%c0_15, %c0_16, %c0_17] : memref<2x8x128xf32, #tpu.memory_space<vmem>>, vector<2x8x128xf32>
      tpu.vector_store %arg7[%c0_15, %c0_16, %c0_17], %12 {strides = array<i32>} : memref<2x8x128xf32, #tpu.memory_space<vmem>>, vector<2x8x128xf32>,
    } else {
    }
    %c0 = arith.constant 0 : index
    %c0_1 = arith.constant 0 : index
    %c0_2 = arith.constant 0 : index
    %3 = vector.load %arg7[%c0, %c0_1, %c0_2] : memref<2x8x128xf32, #tpu.memory_space<vmem>>, vector<2x8x128xf32>
    %c0_3 = arith.constant 0 : index
    %c0_4 = arith.constant 0 : index
    %c0_5 = arith.constant 0 : index
    %4 = vector.load %arg3[%c0_3, %c0_4, %c0_5] : memref<2x8x128xf32, #tpu.memory_space<vmem>>, vector<2x8x128xf32>
    %c0_6 = arith.constant 0 : index
    %c0_7 = arith.constant 0 : index
    %c0_8 = arith.constant 0 : index
    %5 = vector.load %arg4[%c0_6, %c0_7, %c0_8] : memref<2x128x128xf32, #tpu.memory_space<vmem>>, vector<2x128x128xf32>
    "tpu.trace_start"() <{level = 10 : i32, message = "mbi,mio->mbo"}> : () -> ()
    %cst = arith.constant dense<0.000000e+00> : vector<2x8x128xf32>
    %6 = tpu.matmul %4, %5, %cst {dimension_numbers = #tpu.dot_dimension_numbers<[2], [1], [1], [2], [0, 0, 0, 1, 1, 2], [0], [0]>} : vector<2x8x128xf32>, vector<2x128x128xf32>, vector<2x8x128xf32> -> vector<2x8x128xf32>
    "tpu.trace_stop"() : () -> ()
    %7 = arith.addf %3, %6 : vector<2x8x128xf32>
    %c0_9 = arith.constant 0 : index
    %c0_10 = arith.constant 0 : index
    %c0_11 = arith.constant 0 : index
    %8 = vector.load %arg7[%c0_9, %c0_10, %c0_11] : memref<2x8x128xf32, #tpu.memory_space<vmem>>, vector<2x8x128xf32>
    tpu.vector_store %arg7[%c0_9, %c0_10, %c0_11], %7 {strides = array<i32>} : memref<2x8x128xf32, #tpu.memory_space<vmem>>, vector<2x8x128xf32>,
    %c0_i32_12 = arith.constant 0 : i32
    %9 = arith.cmpi eq, %arg2, %c0_i32_12 : i32
    %10 = arith.extui %9 : i1 to i32
    %c0_i32_13 = arith.constant 0 : i32
    %11 = arith.cmpi ne, %10, %c0_i32_13 : i32
    scf.if %11 {
      %c0_14 = arith.constant 0 : index
      %c0_15 = arith.constant 0 : index
      %c0_16 = arith.constant 0 : index
      %12 = vector.load %arg7[%c0_14, %c0_15, %c0_16] : memref<2x8x128xf32, #tpu.memory_space<vmem>>, vector<2x8x128xf32>
      %c0_17 = arith.constant 0 : index
      %c0_18 = arith.constant 0 : index
      %c0_19 = arith.constant 0 : index
      %13 = vector.load %arg5[%c0_17, %c0_18, %c0_19] : memref<2x1x128xf32, #tpu.memory_space<vmem>>, vector<2x1x128xf32>
      %14 = vector.broadcast %13 : vector<2x1x128xf32> to vector<2x8x128xf32>
      %15 = arith.addf %12, %14 : vector<2x8x128xf32>
      %c0_20 = arith.constant 0 : index
      %c0_21 = arith.constant 0 : index
      %c0_22 = arith.constant 0 : index
      %16 = vector.load %arg6[%c0_20, %c0_21, %c0_22] : memref<2x8x128xf32, #tpu.memory_space<vmem>>, vector<2x8x128xf32>
      tpu.vector_store %arg6[%c0_20, %c0_21, %c0_22], %15 {strides = array<i32>} : memref<2x8x128xf32, #tpu.memory_space<vmem>>, vector<2x8x128xf32>,
    } else {
    }
    return
  }
  func.func @transform_0(%arg0: i32, %arg1: i32, %arg2: i32) -> (i32, i32, i32) {
    %c0_i32 = arith.constant 0 : i32
    %c0_i32_0 = arith.constant 0 : i32
    return %arg0, %c0_i32, %arg2 : i32, i32, i32
  }
  func.func @transform_1(%arg0: i32, %arg1: i32, %arg2: i32) -> (i32, i32, i32) {
    %c0_i32 = arith.constant 0 : i32
    return %arg0, %arg2, %arg1 : i32, i32, i32
  }
  func.func @transform_2(%arg0: i32, %arg1: i32, %arg2: i32) -> (i32, i32, i32) {
    %c0_i32 = arith.constant 0 : i32
    %c0_i32_0 = arith.constant 0 : i32
    return %arg0, %c0_i32, %arg1 : i32, i32, i32
  }
  func.func @transform_3(%arg0: i32, %arg1: i32, %arg2: i32) -> (i32, i32, i32) {
    %c0_i32 = arith.constant 0 : i32
    %c0_i32_0 = arith.constant 0 : i32
    return %arg0, %c0_i32, %arg1 : i32, i32, i32
  }
}

</mosaic_0001>

<bundles_post_ra>
// kernel: tpu_custom_call.1
= control target key start
LH: loop header
LB: loop body
LE: loop exit
PB: predicated region body
PF: predicated region fallthrough
CT: control target
= control target key end

     0   :  { %8 = vsyncpa [#allocation4], 0  ;;  %s1370_s0 = inlined_call_operand.hbm [shape: f32[4,8,128], index: 0, kind: input, shape index: {}]   ;;  %s1371_s1 = inlined_call_operand.hbm [shape: f32[4,128,128], index: 1, kind: input, shape index: {}]   ;;  %s1372_s2 = inlined_call_operand.vmem [shape: f32[4,1,128], index: 2, kind: input, shape index: {}]   ;;  %s1373_s3 = inlined_call_operand.hbm [shape: f32[4,8,128], index: 3, kind: output, shape index: {}]  }
   0x1   :  { %10 = vsyncpa [#allocation4 + $0x1], 0 }
   0x2   :  { %11 = vsyncpa [#allocation7], 0 }
   0x3   :  { %13 = vsyncpa [#allocation7 + $0x1], 0 }
   0x4   :  { %14 = vsyncpa [#allocation5], 0 }
   0x5   :  { %16 = vsyncpa [#allocation5 + $0x1], 0  ;;  %s1077_s12 = smov 0   ;;  %s1079_s13 = smov 0  }
   0x6   :  { %s1081_s14 = smov 0   ;;  %s1083_s15 = smov 0  }
   0x7   :  { %s1085_s16 = smov 0   ;;  %s1087_s17 = smov 0  }
   0x8 LB: > { %s646_s18 = sadd.s32 4294967295, %s1045_s17   ;;  %s647_s19 = sadd.s32 4294967294, %s1045_s17   ;;  %s1045_s17 = sphi %s1087_s17, %s22_s17   ;;  %s1041_s16 = sphi %s1085_s16, %s1391_s16   ;;  %s1037_s15 = sphi %s1083_s15, %s1390_s15   ;;  %s1033_s14 = sphi %s1081_s14, %s1389_s14   ;;  %s1029_s13 = sphi %s1079_s13, %s1388_s13   ;;  %s1025_s12 = sphi %s1077_s12, %s1387_s12  }
   0x9   : > { %s41_s20 = sadd.s32 1, %s1041_s16  ;;  %s50_s21 = sadd.s32 1, %s1033_s14 }
   0xa   : > { %p43_p0 = scmp.ge.s32.totalorder %s41_s20, 2  ;;  %p57_p1 = scmp.ne.s32.totalorder %s1033_s14, %s1029_s13 }
   0xb   : > { %p58_p2 = scmp.eq.s32.totalorder %s1045_s17, 0  ;;  %p63_p3 = scmp.ne.s32.totalorder %s1029_s13, %s1025_s12 }
   0xc   : > { %s1393_s20 = smov (%p43_p0, %s41_s20), 0  ;;  %p64_p5 = scmp.eq.s32.totalorder %s646_s18, 0 }
   0xd   : > { %p1118_p4 = por %p58_p2, %p57_p1  ;;  %s45_s23 = ssub.s32 %s1041_s16, %s1393_s20 }
   0xe   : > { %p147_p6 = scmp.eq.s32.totalorder %s646_s18, 1  ;;  %p48_p7 = scmp.eq.s32.totalorder %s45_s23, 0 }
   0xf   : > { %p1124_p8 = por %p64_p5, %p63_p3  ;;  %p153_p10 = scmp.eq.s32.totalorder %s647_s19, 1 }
  0x10   : > { %p1128_p9 = por %p147_p6, %p57_p1  ;;  %p842_p13 = scmp.lt.s32.totalorder %s1045_s17, 2 }
  0x11   : > { %s1377_s24 = scalar_select %p1124_p8, 1, 0 }
  0x12   : > { %s1378_s25 = scalar_select %p1128_p9, 1, 0 }
  0x13   : > { %s1133_s26 = scalar_select %p48_p7, %s1033_s14, %s50_s21  }
  0x14   : > { %p1135_p11 = por %p153_p10, %p63_p3  ;;  %s1142_s28 = sand.u32 1, %s1033_s14  }
  0x15   : > { %s650_s29 = sshll.u32 %s1142_s28, 4  ;;  %s669_s30 = sshll.u32 %s1041_s16, 8 }
  0x16   : > { %s1379_s27 = scalar_select %p1135_p11, 1, 0 }
  0x17   : > { %s1149_s6 = scalar_lea.hbm %s1370_s0, %s669_s30  ;;  %s177_s7 = scalar_lea.vmem [#allocation3], %s650_s29 }
  0x18   : > { %s185_s8 = sshll.u32 %s177_s7, 4  ;;  %p1155_p0 = pnand %p842_p13, %p1118_p4  ;;  %s1151_s8 = int_to_ptr.vmem [resolvable:$true] %s185_s8 }
  0x19   : > { %s174_s10 = scalar_lea.sflag [#allocation4], %s1142_s28  ;;  %s899_s11 = scalar_lea.hbm %s1149_s6, 256 }
  0x1a   : > { %p900_p2 = scmp.ne.s32.totalorder %s1149_s6, %s899_s11  ;;  %p901_p3 = pneg %p1155_p0 }
  0x1b   : > { %s904_s21 = scalar_lea.hbm %s1370_s0, 512  ;;  %p905_p4 = scmp.lt.u32.totalorder %s1149_s6, %s1370_s0 }
  0x1c   : > { %p902_p5 = pnand %p901_p3, %p900_p2  ;;  %p906_p7 = scmp.lt.u32.totalorder %s904_s21, %s899_s11 }
  0x1d   : > { %p908_p13 = scmp.lt.u32.totalorder %s899_s11, %s1149_s6 }
  0x1e   : > { %p903_p6 = pneg %p902_p5  ;;  %p907_p10 = por %p906_p7, %p905_p4 }
  0x20   : > { %p909_p12 = por %p908_p13, %p907_p10 }
  0x22   : > { %p910_p1 = pnand %p909_p12, %p903_p6 }
  0x24   : > { %913 = shalt.err (!%p910_p1)
}
  0x25   : > { %s914_s29 = scalar_lea.vmem %s1151_s8, 256  ;;  %s1047_s30 = smov [#allocation3]  }
  0x26   : > { %p915_p2 = scmp.ne.s32.totalorder %s1151_s8, %s914_s29  ;;  %s919_s4 = sshll.u32 %s1047_s30, 4  ;;  %s920_s4 = int_to_ptr.vmem [resolvable:$false] %s919_s4 }
  0x27   : > { %s921_s5 = scalar_lea.vmem %s920_s4, 512  ;;  %p922_p9 = scmp.lt.s32.totalorder %s1151_s8, %s920_s4 }
  0x28   : > { %p917_p5 = pnand %p915_p2, %p901_p3  ;;  %p923_p4 = scmp.lt.s32.totalorder %s921_s5, %s914_s29 }
  0x2a   : > { %p918_p11 = pneg %p917_p5  ;;  %p924_p7 = por %p923_p4, %p922_p9 }
  0x2c   : > { %p925_p10 = pnand %p924_p7, %p918_p11 }
  0x2e   : > { %928 = shalt.err (!%p925_p10)
}
  0x2f   : > { %s1048_s7 = smov 128   ;;  %s1049_s11 = smov 8  }
  0x30   : > { %834 = dma.hbm_to_vmem [thread:$0]  (!%p1155_p0), %s1149_s6, 256, %s1151_s8, %s174_s10, %s1048_s7, %s1048_s7, %s1049_s11  }
  0x31   : > { %p229_p9 = scmp.lt.s32.totalorder %s1045_s17, 3  ;;  %s653_s18 = sshll.u32 %s1142_s28, 8 }
  0x32   : > { %s671_s19 = sshll.u32 %s1041_s16, 12  ;;  %p1381_p11 = scmp.ge.s32.totalorder %s1045_s17, 1 }
  0x33   : > { %s1203_s29 = scalar_lea.hbm %s1371_s1, %s671_s19  ;;  %s199_s30 = scalar_lea.vmem [#allocation6], %s653_s18 }
  0x34   : > { %p1196_p12 = pnand %p1381_p11, %p229_p9  ;;  %s210_s4 = sshll.u32 %s199_s30, 4  ;;  %s1205_s4 = int_to_ptr.vmem [resolvable:$true] %s210_s4 }
  0x35   : > { %s196_s6 = scalar_lea.sflag [#allocation7], %s1142_s28  ;;  %s929_s8 = scalar_lea.hbm %s1203_s29, 4096 }
  0x36   : > { %p930_p1 = scmp.ne.s32.totalorder %s1203_s29, %s929_s8  ;;  %s934_s19 = scalar_lea.hbm %s1371_s1, 8192 }
  0x37   : > { %p935_p2 = scmp.lt.u32.totalorder %s1203_s29, %s1371_s1  ;;  %p936_p5 = scmp.lt.u32.totalorder %s934_s19, %s929_s8 }
  0x38   : > { %p932_p6 = pnand %p930_p1, %p901_p3  ;;  %p938_p7 = scmp.lt.u32.totalorder %s929_s8, %s1203_s29 }
  0x39   : > { %p937_p4 = por %p936_p5, %p935_p2 }
  0x3a   : > { %p933_p13 = pneg %p932_p6 }
  0x3b   : > { %p939_p10 = por %p938_p7, %p937_p4 }
  0x3d   : > { %p940_p9 = pnand %p939_p10, %p933_p13 }
  0x3f   : > { %943 = shalt.err (!%p940_p9)
}
  0x40   : > { %s944_s18 = scalar_lea.vmem %s1205_s4, 4096  ;;  %s1050_s30 = smov [#allocation6]  }
  0x41   : > { %p945_p11 = scmp.ne.s32.totalorder %s1205_s4, %s944_s18  ;;  %s949_s10 = sshll.u32 %s1050_s30, 4  ;;  %s950_s10 = int_to_ptr.vmem [resolvable:$false] %s949_s10 }
  0x42   : > { %s951_s5 = scalar_lea.vmem %s950_s10, 8192  ;;  %p952_p8 = scmp.lt.s32.totalorder %s1205_s4, %s950_s10 }
  0x43   : > { %p947_p1 = pnand %p945_p11, %p901_p3  ;;  %p953_p2 = scmp.lt.s32.totalorder %s951_s5, %s944_s18 }
  0x45   : > { %p948_p6 = pneg %p947_p1  ;;  %p954_p5 = por %p953_p2, %p952_p8 }
  0x47   : > { %p955_p4 = pnand %p954_p5, %p948_p6 }
  0x49   : > { %958 = shalt.err (!%p955_p4)
}
  0x4a   : > { %837 = dma.hbm_to_vmem [thread:$0]  (!%p1155_p0), %s1203_s29, 4096, %s1205_s4, %s196_s6, %s1048_s7, %s1048_s7, %s1049_s11  }
  0x4b   : > { %233 = sbr.rel (%p1196_p12) target bundleno = 350 (0x15e), region = 32  ;;  %s1239_s8 = sand.u32 (!%p1196_p12), 1, %s1029_s13  }
  0x4c   : > { %s658_s19 = sshll.u32 (!%p1196_p12), %s1239_s8, 4  ;;  %s236_s9 = scalar_lea.sflag (!%p1196_p12), [#allocation4], %s1239_s8 }
  0x4d   : > { %s1245_s22 = scalar_lea.vmem (!%p1196_p12), [#allocation3], %s658_s19  ;;  %p1383_p8 = scmp.ne.s32.totalorder (!%p1196_p12), %s1377_s24, 0 }
  0x52   : > { %1012 = dma.done.wait (%p1383_p8), %s236_s9, 256  }
  0x53   : > { %1014 = vsyncadd (%p1383_p8), %s236_s9, 4294967040  ;;  %s659_s28 = sshll.u32 %s1239_s8, 8  ;;  %s245_s7 = scalar_lea.sflag [#allocation7], %s1239_s8 }
  0x54   : > { %s1253_s11 = scalar_lea.vmem [#allocation6], %s659_s28 }
  0x55   : > { %1016 = dma.done.wait (%p1383_p8), %s245_s7, 4096  }
  0x56   : > { %1018 = vsyncadd (%p1383_p8), %s245_s7, 4294963200  ;;  %v1051_v0 = vmov 0.0|0.0   ;;  %vm1052_vm0 = vmmov 0   ;;  %v1053_v1 = vmov 0.0   ;;  %v305_v2 = vld [vmem:[%s1253_s11] sm:$0xff]  ;;  %v306_v3 = vld [vmem:[%s1253_s11 + $0x8] sm:$0xff] }
  0x57   : > { %777 = vmatprep.subr.bf16.mxu0 %v1051_v0  ;;  %801 = vmatprep.subr.bf16.mxu1 %v1051_v0  ;;  %v321_v4 = vld [vmem:[%s1253_s11 + $0x80] sm:$0xff]  ;;  %v778_v5 = vpack.c.bf16 %v306_v3, %v305_v2  ;;  %v322_v6 = vld [vmem:[%s1253_s11 + $0x88] sm:$0xff]  ;;  %v307_v7 = vld [vmem:[%s1253_s11 + $0x10] sm:$0xff]  ;;  %s661_s24 = sshll.u32 %s1037_s15, 1  ;;  %s282_s6 = scalar_lea.vmem [#allocation8], %s658_s19 }
  0x58   : > { %739 = vmatprep.mubr.msk.f32.mxu0 %vm1052_vm0, %v1053_v1  ;;  %774 = vmatprep.mubr.msk.f32.mxu1 %vm1052_vm0, %v1053_v1  ;;  %v308_v8 = vld [vmem:[%s1253_s11 + $0x18] sm:$0xff]  ;;  %v802_v9 = vpack.c.bf16 %v322_v6, %v321_v4  ;;  %v323_v10 = vld [vmem:[%s1253_s11 + $0x90] sm:$0xff]  ;;  %v309_v14 = vld [vmem:[%s1253_s11 + $0x20] sm:$0xff]  ;;  %p287_p0 = scmp.lt.s32.totalorder %s661_s24, 3  ;;  %s519_s23 = sshll.u32 %s282_s6, 4  ;;  %s1316_s23 = int_to_ptr.vmem [resolvable:$true] %s519_s23 }
  0x59   : > { %v324_v11 = vld [vmem:[%s1253_s11 + $0x98] sm:$0xff]  ;;  %779 = vmatpush3.bf16.msra.mxu0 %v778_v5  ;;  %v781_v12 = vpack.c.bf16 %v308_v8, %v307_v7  ;;  %v310_v15 = vld [vmem:[%s1253_s11 + $0x28] sm:$0xff]  ;;  %v325_v16 = vld [vmem:[%s1253_s11 + $0xa0] sm:$0xff]  ;;  %s672_s18 = sshll.u32 %s1037_s15, 8  ;;  %s505_s15 = scalar_lea.sflag [#allocation5], %s1239_s8 }
  0x5a   : > { %803 = vmatpush3.bf16.msra.mxu1 %v802_v9  ;;  %780 = vmatprep.subr.bf16.mxu0 %v1051_v0  ;;  %v805_v13 = vpack.c.bf16 %v324_v11, %v323_v10  ;;  %v326_v17 = vld [vmem:[%s1253_s11 + $0xa8] sm:$0xff]  ;;  %v784_v18 = vpack.c.bf16 %v310_v15, %v309_v14  ;;  %v311_v20 = vld [vmem:[%s1253_s11 + $0x30] sm:$0xff]  ;;  %v312_v21 = vld [vmem:[%s1253_s11 + $0x38] sm:$0xff]  ;;  %s1395_s24 = smov (!%p287_p0, %s661_s24), 3  ;;  %s1321_s5 = scalar_lea.hbm %s1373_s3, %s672_s18 }
  0x5b   : > { %804 = vmatprep.subr.bf16.mxu1 %v1051_v0  ;;  %v808_v19 = vpack.c.bf16 %v326_v17, %v325_v16  ;;  %v327_v22 = vld [vmem:[%s1253_s11 + $0xb0] sm:$0xff]  ;;  %v328_v23 = vld [vmem:[%s1253_s11 + $0xb8] sm:$0xff]  ;;  %v787_v24 = vpack.c.bf16 %v312_v21, %v311_v20  ;;  %v313_v26 = vld [vmem:[%s1253_s11 + $0x40] sm:$0xff]  ;;  %s292_s4 = scalar_lea.vmem %s1372_s2, %s1395_s24  ;;  %s959_s19 = scalar_lea.vmem %s1316_s23, 256 }
  0x5c   : > { %v811_v25 = vpack.c.bf16 %v328_v23, %v327_v22  ;;  %v314_v27 = vld [vmem:[%s1253_s11 + $0x48] sm:$0xff]  ;;  %v329_v28 = vld [vmem:[%s1253_s11 + $0xc0] sm:$0xff]  ;;  %v315_v32 = vld [vmem:[%s1253_s11 + $0x50] sm:$0xff]  ;;  %p960_p3 = scmp.ne.s32.totalorder %s1316_s23, %s959_s19  ;;  %p1384_p12 = scmp.ne.s32.totalorder %s1378_s25, 0 }
  0x5d   : > { %782 = vmatpush3.bf16.msra.mxu0 %v781_v12  ;;  %v330_v29 = vld [vmem:[%s1253_s11 + $0xc8] sm:$0xff]  ;;  %v790_v30 = vpack.c.bf16 %v314_v27, %v313_v26  ;;  %v316_v33 = vld [vmem:[%s1253_s11 + $0x58] sm:$0xff]  ;;  %v331_v34 = vld [vmem:[%s1253_s11 + $0xd0] sm:$0xff]  ;;  %s1054_s9 = smov [#allocation8]  }
  0x5e   : > { %806 = vmatpush3.bf16.msra.mxu1 %v805_v13  ;;  %783 = vmatprep.subr.bf16.mxu0 %v1051_v0  ;;  %v814_v31 = vpack.c.bf16 %v330_v29, %v329_v28  ;;  %v332_v35 = vld [vmem:[%s1253_s11 + $0xd8] sm:$0xff]  ;;  %v793_v36 = vpack.c.bf16 %v316_v33, %v315_v32  ;;  %v317_v38 = vld [vmem:[%s1253_s11 + $0x60] sm:$0xff]  ;;  %v318_v39 = vld [vmem:[%s1253_s11 + $0x68] sm:$0xff]  ;;  %p961_p13 = pnand %p960_p3, %p1384_p12 }
  0x5f   : > { %807 = vmatprep.subr.bf16.mxu1 %v1051_v0  ;;  %v817_v37 = vpack.c.bf16 %v332_v35, %v331_v34  ;;  %v333_v40 = vld [vmem:[%s1253_s11 + $0xe0] sm:$0xff]  ;;  %v334_v41 = vld [vmem:[%s1253_s11 + $0xe8] sm:$0xff]  ;;  %v796_v42 = vpack.c.bf16 %v318_v39, %v317_v38  ;;  %v319_v44 = vld [vmem:[%s1253_s11 + $0x70] sm:$0xff] }
  0x60   : > { %v820_v43 = vpack.c.bf16 %v334_v41, %v333_v40  ;;  %v320_v45 = vld [vmem:[%s1253_s11 + $0x78] sm:$0xff]  ;;  %v335_v46 = vld [vmem:[%s1253_s11 + $0xf0] sm:$0xff]  ;;  %v662_v52 = vld [vmem:[%s292_s4] ss:$0 sm:$0xff]  ;;  %p962_p7 = pneg %p961_p13 }
  0x61   : > { %785 = vmatpush3.bf16.msra.mxu0 %v784_v18  ;;  %v336_v47 = vld [vmem:[%s1253_s11 + $0xf8] sm:$0xff]  ;;  %v799_v48 = vpack.c.bf16 %v320_v45, %v319_v44  ;;  %v303_v50 = vld [vmem:[%s1245_s22] sm:$0xff] }
  0x62   : > { %809 = vmatpush3.bf16.msra.mxu1 %v808_v19  ;;  %786 = vmatprep.subr.bf16.mxu0 %v1051_v0  ;;  %v823_v49 = vpack.c.bf16 %v336_v47, %v335_v46  ;;  %v304_v51 = vld [vmem:[%s1245_s22 + $0x8] sm:$0xff]  ;;  %v663_v53 = vld [vmem:[%s292_s4 + $0x1] ss:$0 sm:$0xff]  ;;  %s963_s22 = sshll.u32 %s1054_s9, 4  ;;  %s964_s22 = int_to_ptr.vmem [resolvable:$false] %s963_s22 }
  0x63   : > { %810 = vmatprep.subr.bf16.mxu1 %v1051_v0  ;;  %s965_s28 = scalar_lea.vmem %s964_s22, 512  ;;  %p966_p10 = scmp.lt.s32.totalorder %s1316_s23, %s964_s22 }
  0x64   : > { %p967_p9 = scmp.lt.s32.totalorder %s965_s28, %s959_s19 }
  0x65   : > { %788 = vmatpush3.bf16.msra.mxu0 %v787_v24 }
  0x66   : > { %812 = vmatpush3.bf16.msra.mxu1 %v811_v25  ;;  %789 = vmatprep.subr.bf16.mxu0 %v1051_v0  ;;  %p968_p11 = por %p967_p9, %p966_p10 }
  0x67   : > { %813 = vmatprep.subr.bf16.mxu1 %v1051_v0 }
  0x68   : > { %p969_p1 = pnand %p968_p11, %p962_p7 }
  0x69   : > { %791 = vmatpush3.bf16.msra.mxu0 %v790_v30 }
  0x6a   : > { %815 = vmatpush3.bf16.msra.mxu1 %v814_v31  ;;  %792 = vmatprep.subr.bf16.mxu0 %v1051_v0 }
  0x6b   : > { %816 = vmatprep.subr.bf16.mxu1 %v1051_v0 }
  0x6d   : > { %794 = vmatpush3.bf16.msra.mxu0 %v793_v36 }
  0x6e   : > { %818 = vmatpush3.bf16.msra.mxu1 %v817_v37  ;;  %795 = vmatprep.subr.bf16.mxu0 %v1051_v0 }
  0x6f   : > { %819 = vmatprep.subr.bf16.mxu1 %v1051_v0 }
  0x71   : > { %797 = vmatpush3.bf16.msra.mxu0 %v796_v42 }
  0x72   : > { %821 = vmatpush3.bf16.msra.mxu1 %v820_v43  ;;  %798 = vmatprep.subr.bf16.mxu0 %v1051_v0 }
  0x73   : > { %822 = vmatprep.subr.bf16.mxu1 %v1051_v0 }
  0x75   : > { %800 = vmatpush3.bf16.msra.mxu0 %v799_v48 }
  0x76   : > { %824 = vmatpush3.bf16.msra.mxu1 %v823_v49 }
  0x78   : > { %740 = vmatmul.mubr.f32.vlgmr.msra.gmra.mrb[0].mxu0 %v303_v50 }
  0x79   : > { %775 = vmatmul.mubr.f32.vlgmr.msra.gmra.mrb[0].mxu1 %v304_v51 }
 0x14b   : > { %v403_v54 = vpop.f32.mrb[0].mxu0 }
 0x14c   : > { %v500_v55 = vadd.f32 %v662_v52, %v403_v54  ;;  %v473_v56 = vpop.f32.mrb[0].mxu1  ;;  %v741_v57 = vpop.f32.mrb[1].mxu0 }
 0x14d   : > { %v501_v58 = vadd.f32 %v663_v53, %v473_v56  ;;  %v776_v59 = vpop.f32.mrb[1].mxu1 }
 0x14e   : > { %502 = vst [vmem:[%s282_s6] sm:$0xff] %v500_v55 }
 0x14f   : > { %503 = vst [vmem:[%s282_s6 + $0x8] sm:$0xff] %v501_v58 }
 0x150   : > { %972 = shalt.err (!%p969_p1)
}
 0x151   : > { %s973_s7 = scalar_lea.hbm %s1321_s5, 256  ;;  %s977_s21 = scalar_lea.hbm %s1373_s3, 512 }
 0x152   : > { %p974_p6 = scmp.ne.s32.totalorder %s1321_s5, %s973_s7  ;;  %p978_p4 = scmp.lt.u32.totalorder %s1321_s5, %s1373_s3 }
 0x153   : > { %p979_p8 = scmp.lt.u32.totalorder %s977_s21, %s973_s7  ;;  %p981_p3 = scmp.lt.u32.totalorder %s973_s7, %s1321_s5 }
 0x154   : > { %p975_p2 = pnand %p974_p6, %p1384_p12 }
 0x155   : > { %p980_p0 = por %p979_p8, %p978_p4 }
 0x156   : > { %p976_p5 = pneg %p975_p2 }
 0x157   : > { %p982_p13 = por %p981_p3, %p980_p0 }
 0x159   : > { %p983_p7 = pnand %p982_p13, %p976_p5 }
 0x15b   : > { %986 = shalt.err (!%p983_p7)
}
 0x15c   : > { %s1055_s6 = smov 128   ;;  %s1056_s18 = smov 8  }
 0x15d   : > { %829 = dma.vmem_to_hbm [thread:$0]  (%p1384_p12), %s1316_s23, 256, %s1321_s5, %s505_s15, %s1055_s6, %s1055_s6, %s1056_s18  }
 0x15e PF: > { %s534_s30 = sand.u32 1, %s1025_s12   ;;  %p1385_p10 = scmp.ne.s32.totalorder %s1379_s27, 0 }
 0x15f   : > { %p1386_p9 = scmp.ge.s32.totalorder %s1045_s17, 2  ;;  %s535_s10 = scalar_lea.sflag [#allocation5], %s534_s30 }
 0x161   : > { %p839_p11 = pnand %p1386_p9, %p1385_p10 }
 0x163   : > { %1020 = dma.done.wait (!%p839_p11), %s535_s10, 256  }
 0x164   : > { %1022 = vsyncadd (!%p839_p11), %s535_s10, 4294967040  ;;  %s22_s17 = sadd.s32 1, %s1045_s17   ;;  %s1387_s12 = smov %s1029_s13 }
 0x165   : > { %p19_p1 = scmp.ge.s32.totalorder %s22_s17, 4   ;;  %s1388_s13 = smov %s1033_s14 }
 0x166   : > { %s1389_s14 = smov %s1133_s26  ;;  %s1390_s15 = smov %s1041_s16 }
 0x167   : > { %s1391_s16 = smov %s1393_s20  ;;  %21 = sbr.rel (!%p19_p1) target bundleno = 8 (0x8), region = 101 }
 0x16e   :  { %540 = vsyncpa [#allocation4], 1 }
 0x16f   :  { %542 = vsyncpa [#allocation4 + $0x1], 1 }
 0x170   :  { %543 = vsyncpa [#allocation7], 1 }
 0x171   :  { %545 = vsyncpa [#allocation7 + $0x1], 1 }
 0x172   :  { %546 = vsyncpa [#allocation5], 1 }
 0x173   :  { %548 = vsyncpa [#allocation5 + $0x1], 1 }

</bundles_post_ra>
